<compile_context>
chip_gen: v7x
topology: tpu7x:2x2x1
jax: 0.10.0
libtpu: 0.0.40
codegen_flags: <defaults>
</compile_context>

<pallas_src>
import jax
import jax.numpy as jnp
from jax import lax
from jax.experimental import pallas as pl
from jax.experimental.pallas import tpu as pltpu

EPS = 1e-5          # nn.BatchNorm2d default eps
NEG_SLOPE = 0.01    # nn.LeakyReLU default negative_slope


# ---------------------------------------------------------------------------
# Fused Pallas kernel
# ---------------------------------------------------------------------------
def _batchnorm_rows(y, gamma, beta):
    """Training-mode BatchNorm over rows; single-pass (E[y], E[y^2]) stats."""
    mean = jnp.mean(y, axis=0, keepdims=True)
    mean_sq = jnp.mean(y * y, axis=0, keepdims=True)
    var = mean_sq - mean * mean                       # biased variance
    scale = gamma * lax.rsqrt(var + EPS)
    return y * scale + (beta - mean * scale)


def fused_discriminator_kernel(p1_ref, w1_ref, b1_ref, g1_ref, be1_ref,
                               w2_ref, b2_ref, g2_ref, be2_ref,
                               wfct_ref, sel_ref, bfc_ref, o_ref):
    """conv1+LReLU+BN1 -> conv2+LReLU+BN2 -> Linear+Sigmoid, all in VMEM.

    p1 rows are ordered (kh, kw, b, h2, w2) (tap-major), so the conv2 patch
    regroup is 4 contiguous row blocks of the stage-1 activations."""
    rows1 = p1_ref.shape[0]       # 4 * B * H2 * W2
    rows2 = rows1 // 4            # B * H2 * W2
    c1 = w1_ref.shape[1]

    # --- stage 1: conv1 (2x2/stride-2 as matmul on patches) + LReLU + BN1 ---
    y1 = jnp.dot(p1_ref[...], w1_ref[...], preferred_element_type=jnp.float32)
    y1 = y1 + b1_ref[...]
    y1 = jnp.where(y1 > 0, y1, NEG_SLOPE * y1)
    y1 = _batchnorm_rows(y1, g1_ref[...], be1_ref[...])      # (rows1, c1)

    # --- stage 2: conv2 as a sum over the 4 taps (contiguous row slices) ---
    w2 = w2_ref[...]                                         # (4*c1, c2)
    y2 = b2_ref[...] + jnp.dot(y1[0:rows2, :], w2[0:c1, :],
                               preferred_element_type=jnp.float32)
    for t in range(1, 4):
        y2 = y2 + jnp.dot(y1[t * rows2:(t + 1) * rows2, :],
                          w2[t * c1:(t + 1) * c1, :],
                          preferred_element_type=jnp.float32)
    y2 = jnp.where(y2 > 0, y2, NEG_SLOPE * y2)
    y2 = _batchnorm_rows(y2, g2_ref[...], be2_ref[...])      # (rows2, c2)

    # --- stage 3: Linear + Sigmoid (VPU multiply + per-batch segment sum) ---
    prod = y2 * wfct_ref[...]                                # (rows2, c2)
    logit = jnp.dot(sel_ref[...], prod,
                    preferred_element_type=jnp.float32)      # (B, c2)
    logit = jnp.sum(logit, axis=1, keepdims=True) + bfc_ref[...]   # (B, 1)
    o_ref[...] = 1.0 / (1.0 + jnp.exp(-logit))


# ---------------------------------------------------------------------------
# One-time weight relayout (hoisted out of the forward pass)
# ---------------------------------------------------------------------------
def prepare_params(params, batch_size, img_size):
    (w1, b1, g1, be1, w2, b2, g2, be2, wfc, bfc) = params
    c1, c2 = w1.shape[0], w2.shape[0]
    h2, w2sp = img_size[0] // 4, img_size[1] // 4
    hw2 = h2 * w2sp
    rows2 = batch_size * hw2

    w1m = w1.reshape(c1, 4).T                                      # (4, c1), feat (kh1,kw1)
    w2m = jnp.transpose(w2, (2, 3, 1, 0)).reshape(4 * c1, c2)      # rows (kh,kw,c1)
    # PyTorch NCHW flatten index is c*hw2 + hw; our rows are (b, hw) with channel cols.
    wfc_r = wfc.reshape(c2, hw2).T                                 # (hw2, c2)
    wfc_t = jnp.tile(wfc_r, (batch_size, 1))                       # (rows2, c2)
    sel = (jnp.arange(rows2)[None, :] // hw2
           == jnp.arange(batch_size)[:, None]).astype(jnp.float32)  # (B, rows2)

    return (w1m, b1.reshape(1, c1), g1.reshape(1, c1), be1.reshape(1, c1),
            w2m, b2.reshape(1, c2), g2.reshape(1, c2), be2.reshape(1, c2),
            wfc_t, sel, bfc.reshape(1, 1))


# ---------------------------------------------------------------------------
# Forward: input patch extraction (glue) + single fused pallas_call
# ---------------------------------------------------------------------------
def discriminator_forward(x, prep):
    """x: (B, 1, H, W) NCHW float32 -> (B, 1) sigmoid scores."""
    B, _, H, W = x.shape
    H2, W2 = H // 4, W // 4

    # 2x2/stride-2 conv1 patches; row order tap-major so conv2 needs only
    # contiguous slices inside the kernel:
    #   (b, h2, kh, kh1, w2, kw, kw1) -> (kh, kw, b, h2, w2 | kh1, kw1)
    p = x.reshape(B, H2, 2, 2, W2, 2, 2)
    p1 = p.transpose(2, 5, 0, 1, 4, 3, 6).reshape(4 * B * H2 * W2, 4)

    vmem = pl.BlockSpec(memory_space=pltpu.MemorySpace.VMEM)
    return pl.pallas_call(
        fused_discriminator_kernel,
        out_shape=jax.ShapeDtypeStruct((B, 1), jnp.float32),
        in_specs=[vmem] * 12,
        out_specs=vmem,
    )(p1, *prep)


# ---------------------------------------------------------------------------
# Pure-JAX reference (direct conv / NCHW) for validation
# ---------------------------------------------------------------------------
def _reference_forward(x, params):
    (w1, b1, g1, be1, w2, b2, g2, be2, wfc, bfc) = params

    def block(inp, w, b, g, be):
        y = lax.conv_general_dilated(
            inp, w, window_strides=(2, 2), padding="VALID",
            dimension_numbers=("NCHW", "OIHW", "NCHW"))
        y = y + b[None, :, None, None]
        y = jnp.where(y > 0, y, NEG_SLOPE * y)
        mean = jnp.mean(y, axis=(0, 2, 3), keepdims=True)
        var = jnp.mean((y - mean) ** 2, axis=(0, 2, 3), keepdims=True)
        y = (y - mean) * lax.rsqrt(var + EPS)
        return y * g[None, :, None, None] + be[None, :, None, None]

    feat = block(block(x, w1, b1, g1, be1), w2, b2, g2, be2)
    flat = feat.reshape(feat.shape[0], -1)                      # NCHW flatten
    y = flat @ wfc.T + bfc
    return 1.0 / (1.0 + jnp.exp(-y))


# ---------------------------------------------------------------------------
if __name__ == "__main__":
    # Small, module-consistent shapes: filters=8, img_size=(16,16), batch=2.
    B, F = 2, 8
    H = W = 16
    C1, C2 = F, 2 * F
    FC_IN = C2 * (H // 4) * (W // 4)

    key = jax.random.PRNGKey(0)
    ks = jax.random.split(key, 11)

    x = jax.random.normal(ks[0], (B, 1, H, W), jnp.float32)

    params = (
        0.1 * jax.random.normal(ks[1], (C1, 1, 2, 2), jnp.float32),    # conv1 weight
        0.1 * jax.random.normal(ks[2], (C1,), jnp.float32),            # conv1 bias
        1.0 + 0.1 * jax.random.normal(ks[3], (C1,), jnp.float32),      # bn1 gamma
        0.1 * jax.random.normal(ks[4], (C1,), jnp.float32),            # bn1 beta
        0.1 * jax.random.normal(ks[5], (C2, C1, 2, 2), jnp.float32),   # conv2 weight
        0.1 * jax.random.normal(ks[6], (C2,), jnp.float32),            # conv2 bias
        1.0 + 0.1 * jax.random.normal(ks[7], (C2,), jnp.float32),      # bn2 gamma
        0.1 * jax.random.normal(ks[8], (C2,), jnp.float32),            # bn2 beta
        0.1 * jax.random.normal(ks[9], (1, FC_IN), jnp.float32),       # fc weight
        0.1 * jax.random.normal(ks[10], (1,), jnp.float32),            # fc bias
    )

    prep = prepare_params(params, B, (H, W))       # one-time weight relayout
    fwd = jax.jit(discriminator_forward)
    out = jax.block_until_ready(fwd(x, prep))

    ref = _reference_forward(x, params)
    assert out.shape == (B, 1), out.shape
    assert jnp.allclose(out, ref, atol=1e-4, rtol=1e-4), (out, ref)

    print("KERNEL_OK")
</pallas_src>

<mosaic_0001>
module attributes {stable_mosaic.version = 11 : i64} {
  func.func @fused_discriminator_kernel(%arg0: memref<128x4xf32, #tpu.memory_space<vmem>>, %arg1: memref<4x8xf32, #tpu.memory_space<vmem>>, %arg2: memref<1x8xf32, #tpu.memory_space<vmem>>, %arg3: memref<1x8xf32, #tpu.memory_space<vmem>>, %arg4: memref<1x8xf32, #tpu.memory_space<vmem>>, %arg5: memref<32x16xf32, #tpu.memory_space<vmem>>, %arg6: memref<1x16xf32, #tpu.memory_space<vmem>>, %arg7: memref<1x16xf32, #tpu.memory_space<vmem>>, %arg8: memref<1x16xf32, #tpu.memory_space<vmem>>, %arg9: memref<32x16xf32, #tpu.memory_space<vmem>>, %arg10: memref<2x32xf32, #tpu.memory_space<vmem>>, %arg11: memref<1x1xf32, #tpu.memory_space<vmem>>, %arg12: memref<2x1xf32, #tpu.memory_space<vmem>>) attributes {dimension_semantics = [], scalar_prefetch = 0 : i64, scratch_operands = 0 : i64, tpu.core_type = #tpu.core_type<tc>} {
    %c0 = arith.constant 0 : index
    %c0_0 = arith.constant 0 : index
    %0 = vector.load %arg0[%c0, %c0_0] : memref<128x4xf32, #tpu.memory_space<vmem>>, vector<128x4xf32>
    %c0_1 = arith.constant 0 : index
    %c0_2 = arith.constant 0 : index
    %1 = vector.load %arg1[%c0_1, %c0_2] : memref<4x8xf32, #tpu.memory_space<vmem>>, vector<4x8xf32>
    %cst = arith.constant dense<0.000000e+00> : vector<128x8xf32>
    %2 = tpu.matmul %0, %1, %cst {dimension_numbers = #tpu.dot_dimension_numbers<[1], [0], [0], [1], [0, 0, 1, 1], [], []>} : vector<128x4xf32>, vector<4x8xf32>, vector<128x8xf32> -> vector<128x8xf32>
    %c0_3 = arith.constant 0 : index
    %c0_4 = arith.constant 0 : index
    %3 = vector.load %arg2[%c0_3, %c0_4] : memref<1x8xf32, #tpu.memory_space<vmem>>, vector<1x8xf32>
    %4 = vector.broadcast %3 : vector<1x8xf32> to vector<128x8xf32>
    %5 = arith.addf %2, %4 : vector<128x8xf32>
    %cst_5 = arith.constant 0.000000e+00 : f32
    %6 = vector.broadcast %cst_5 : f32 to vector<128x8xf32>
    %7 = arith.cmpf ogt, %5, %6 : vector<128x8xf32>
    %cst_6 = arith.constant 0.00999999977 : f32
    %8 = vector.broadcast %cst_6 : f32 to vector<128x8xf32>
    %9 = arith.mulf %8, %5 : vector<128x8xf32>
    %10 = arith.select %7, %5, %9 : vector<128x8xi1>, vector<128x8xf32>
    %c0_7 = arith.constant 0 : index
    %c0_8 = arith.constant 0 : index
    %11 = vector.load %arg3[%c0_7, %c0_8] : memref<1x8xf32, #tpu.memory_space<vmem>>, vector<1x8xf32>
    %c0_9 = arith.constant 0 : index
    %c0_10 = arith.constant 0 : index
    %12 = vector.load %arg4[%c0_9, %c0_10] : memref<1x8xf32, #tpu.memory_space<vmem>>, vector<1x8xf32>
    %cst_11 = arith.constant dense<0.000000e+00> : vector<8xf32>
    %13 = vector.multi_reduction <add>, %10, %cst_11 [0] : vector<128x8xf32> to vector<8xf32>
    %14 = vector.shape_cast %13 : vector<8xf32> to vector<1x8xf32>
    %cst_12 = arith.constant 1.280000e+02 : f32
    %15 = vector.broadcast %cst_12 : f32 to vector<1x8xf32>
    %16 = arith.divf %14, %15 : vector<1x8xf32>
    %17 = arith.mulf %10, %10 : vector<128x8xf32>
    %cst_13 = arith.constant dense<0.000000e+00> : vector<8xf32>
    %18 = vector.multi_reduction <add>, %17, %cst_13 [0] : vector<128x8xf32> to vector<8xf32>
    %19 = vector.shape_cast %18 : vector<8xf32> to vector<1x8xf32>
    %cst_14 = arith.constant 1.280000e+02 : f32
    %20 = vector.broadcast %cst_14 : f32 to vector<1x8xf32>
    %21 = arith.divf %19, %20 : vector<1x8xf32>
    %22 = arith.mulf %16, %16 : vector<1x8xf32>
    %23 = arith.subf %21, %22 : vector<1x8xf32>
    %cst_15 = arith.constant 9.99999974E-6 : f32
    %24 = vector.broadcast %cst_15 : f32 to vector<1x8xf32>
    %25 = arith.addf %23, %24 : vector<1x8xf32>
    %26 = math.rsqrt %25 : vector<1x8xf32>
    %27 = arith.mulf %11, %26 : vector<1x8xf32>
    %28 = vector.broadcast %27 : vector<1x8xf32> to vector<128x8xf32>
    %29 = arith.mulf %10, %28 : vector<128x8xf32>
    %30 = arith.mulf %16, %27 : vector<1x8xf32>
    %31 = arith.subf %12, %30 : vector<1x8xf32>
    %32 = vector.broadcast %31 : vector<1x8xf32> to vector<128x8xf32>
    %33 = arith.addf %29, %32 : vector<128x8xf32>
    %c0_16 = arith.constant 0 : index
    %c0_17 = arith.constant 0 : index
    %34 = vector.load %arg5[%c0_16, %c0_17] : memref<32x16xf32, #tpu.memory_space<vmem>>, vector<32x16xf32>
    %c0_18 = arith.constant 0 : index
    %c0_19 = arith.constant 0 : index
    %35 = vector.load %arg6[%c0_18, %c0_19] : memref<1x16xf32, #tpu.memory_space<vmem>>, vector<1x16xf32>
    %36 = vector.extract_strided_slice %33 {offsets = [0, 0], sizes = [32, 8], strides = [1, 1]} : vector<128x8xf32> to vector<32x8xf32>
    %37 = vector.extract_strided_slice %34 {offsets = [0, 0], sizes = [8, 16], strides = [1, 1]} : vector<32x16xf32> to vector<8x16xf32>
    %cst_20 = arith.constant dense<0.000000e+00> : vector<32x16xf32>
    %38 = tpu.matmul %36, %37, %cst_20 {dimension_numbers = #tpu.dot_dimension_numbers<[1], [0], [0], [1], [0, 0, 1, 1], [], []>} : vector<32x8xf32>, vector<8x16xf32>, vector<32x16xf32> -> vector<32x16xf32>
    %39 = vector.broadcast %35 : vector<1x16xf32> to vector<32x16xf32>
    %40 = arith.addf %39, %38 : vector<32x16xf32>
    %41 = vector.extract_strided_slice %33 {offsets = [32, 0], sizes = [32, 8], strides = [1, 1]} : vector<128x8xf32> to vector<32x8xf32>
    %42 = vector.extract_strided_slice %34 {offsets = [8, 0], sizes = [8, 16], strides = [1, 1]} : vector<32x16xf32> to vector<8x16xf32>
    %cst_21 = arith.constant dense<0.000000e+00> : vector<32x16xf32>
    %43 = tpu.matmul %41, %42, %cst_21 {dimension_numbers = #tpu.dot_dimension_numbers<[1], [0], [0], [1], [0, 0, 1, 1], [], []>} : vector<32x8xf32>, vector<8x16xf32>, vector<32x16xf32> -> vector<32x16xf32>
    %44 = arith.addf %40, %43 : vector<32x16xf32>
    %45 = vector.extract_strided_slice %33 {offsets = [64, 0], sizes = [32, 8], strides = [1, 1]} : vector<128x8xf32> to vector<32x8xf32>
    %46 = vector.extract_strided_slice %34 {offsets = [16, 0], sizes = [8, 16], strides = [1, 1]} : vector<32x16xf32> to vector<8x16xf32>
    %cst_22 = arith.constant dense<0.000000e+00> : vector<32x16xf32>
    %47 = tpu.matmul %45, %46, %cst_22 {dimension_numbers = #tpu.dot_dimension_numbers<[1], [0], [0], [1], [0, 0, 1, 1], [], []>} : vector<32x8xf32>, vector<8x16xf32>, vector<32x16xf32> -> vector<32x16xf32>
    %48 = arith.addf %44, %47 : vector<32x16xf32>
    %49 = vector.extract_strided_slice %33 {offsets = [96, 0], sizes = [32, 8], strides = [1, 1]} : vector<128x8xf32> to vector<32x8xf32>
    %50 = vector.extract_strided_slice %34 {offsets = [24, 0], sizes = [8, 16], strides = [1, 1]} : vector<32x16xf32> to vector<8x16xf32>
    %cst_23 = arith.constant dense<0.000000e+00> : vector<32x16xf32>
    %51 = tpu.matmul %49, %50, %cst_23 {dimension_numbers = #tpu.dot_dimension_numbers<[1], [0], [0], [1], [0, 0, 1, 1], [], []>} : vector<32x8xf32>, vector<8x16xf32>, vector<32x16xf32> -> vector<32x16xf32>
    %52 = arith.addf %48, %51 : vector<32x16xf32>
    %cst_24 = arith.constant 0.000000e+00 : f32
    %53 = vector.broadcast %cst_24 : f32 to vector<32x16xf32>
    %54 = arith.cmpf ogt, %52, %53 : vector<32x16xf32>
    %cst_25 = arith.constant 0.00999999977 : f32
    %55 = vector.broadcast %cst_25 : f32 to vector<32x16xf32>
    %56 = arith.mulf %55, %52 : vector<32x16xf32>
    %57 = arith.select %54, %52, %56 : vector<32x16xi1>, vector<32x16xf32>
    %c0_26 = arith.constant 0 : index
    %c0_27 = arith.constant 0 : index
    %58 = vector.load %arg7[%c0_26, %c0_27] : memref<1x16xf32, #tpu.memory_space<vmem>>, vector<1x16xf32>
    %c0_28 = arith.constant 0 : index
    %c0_29 = arith.constant 0 : index
    %59 = vector.load %arg8[%c0_28, %c0_29] : memref<1x16xf32, #tpu.memory_space<vmem>>, vector<1x16xf32>
    %cst_30 = arith.constant dense<0.000000e+00> : vector<16xf32>
    %60 = vector.multi_reduction <add>, %57, %cst_30 [0] : vector<32x16xf32> to vector<16xf32>
    %61 = vector.shape_cast %60 : vector<16xf32> to vector<1x16xf32>
    %cst_31 = arith.constant 3.200000e+01 : f32
    %62 = vector.broadcast %cst_31 : f32 to vector<1x16xf32>
    %63 = arith.divf %61, %62 : vector<1x16xf32>
    %64 = arith.mulf %57, %57 : vector<32x16xf32>
    %cst_32 = arith.constant dense<0.000000e+00> : vector<16xf32>
    %65 = vector.multi_reduction <add>, %64, %cst_32 [0] : vector<32x16xf32> to vector<16xf32>
    %66 = vector.shape_cast %65 : vector<16xf32> to vector<1x16xf32>
    %cst_33 = arith.constant 3.200000e+01 : f32
    %67 = vector.broadcast %cst_33 : f32 to vector<1x16xf32>
    %68 = arith.divf %66, %67 : vector<1x16xf32>
    %69 = arith.mulf %63, %63 : vector<1x16xf32>
    %70 = arith.subf %68, %69 : vector<1x16xf32>
    %cst_34 = arith.constant 9.99999974E-6 : f32
    %71 = vector.broadcast %cst_34 : f32 to vector<1x16xf32>
    %72 = arith.addf %70, %71 : vector<1x16xf32>
    %73 = math.rsqrt %72 : vector<1x16xf32>
    %74 = arith.mulf %58, %73 : vector<1x16xf32>
    %75 = vector.broadcast %74 : vector<1x16xf32> to vector<32x16xf32>
    %76 = arith.mulf %57, %75 : vector<32x16xf32>
    %77 = arith.mulf %63, %74 : vector<1x16xf32>
    %78 = arith.subf %59, %77 : vector<1x16xf32>
    %79 = vector.broadcast %78 : vector<1x16xf32> to vector<32x16xf32>
    %80 = arith.addf %76, %79 : vector<32x16xf32>
    %c0_35 = arith.constant 0 : index
    %c0_36 = arith.constant 0 : index
    %81 = vector.load %arg9[%c0_35, %c0_36] : memref<32x16xf32, #tpu.memory_space<vmem>>, vector<32x16xf32>
    %82 = arith.mulf %80, %81 : vector<32x16xf32>
    %c0_37 = arith.constant 0 : index
    %c0_38 = arith.constant 0 : index
    %83 = vector.load %arg10[%c0_37, %c0_38] : memref<2x32xf32, #tpu.memory_space<vmem>>, vector<2x32xf32>
    %cst_39 = arith.constant dense<0.000000e+00> : vector<2x16xf32>
    %84 = tpu.matmul %83, %82, %cst_39 {dimension_numbers = #tpu.dot_dimension_numbers<[1], [0], [0], [1], [0, 0, 1, 1], [], []>} : vector<2x32xf32>, vector<32x16xf32>, vector<2x16xf32> -> vector<2x16xf32>
    %cst_40 = arith.constant dense<0.000000e+00> : vector<2xf32>
    %85 = vector.multi_reduction <add>, %84, %cst_40 [1] : vector<2x16xf32> to vector<2xf32>
    %86 = vector.shape_cast %85 : vector<2xf32> to vector<2x1xf32>
    %c0_41 = arith.constant 0 : index
    %c0_42 = arith.constant 0 : index
    %87 = vector.load %arg11[%c0_41, %c0_42] : memref<1x1xf32, #tpu.memory_space<vmem>>, vector<1x1xf32>
    %88 = vector.broadcast %87 : vector<1x1xf32> to vector<2x1xf32>
    %89 = arith.addf %86, %88 : vector<2x1xf32>
    %cst_43 = arith.constant 0.000000e+00 : f32
    %90 = vector.broadcast %cst_43 : f32 to vector<2x1xf32>
    %91 = arith.subf %90, %89 : vector<2x1xf32>
    %92 = math.exp %91 : vector<2x1xf32>
    %cst_44 = arith.constant 1.000000e+00 : f32
    %93 = vector.broadcast %cst_44 : f32 to vector<2x1xf32>
    %94 = arith.addf %93, %92 : vector<2x1xf32>
    %cst_45 = arith.constant 1.000000e+00 : f32
    %95 = vector.broadcast %cst_45 : f32 to vector<2x1xf32>
    %96 = arith.divf %95, %94 : vector<2x1xf32>
    %c0_46 = arith.constant 0 : index
    %c0_47 = arith.constant 0 : index
    %97 = vector.load %arg12[%c0_46, %c0_47] : memref<2x1xf32, #tpu.memory_space<vmem>>, vector<2x1xf32>
    tpu.vector_store %arg12[%c0_46, %c0_47], %96 {strides = array<i32>} : memref<2x1xf32, #tpu.memory_space<vmem>>, vector<2x1xf32>,
    return
  }
}

</mosaic_0001>

<bundles_post_ra>
// kernel: discriminator_forward.1
= control target key start
LH: loop header
LB: loop body
LE: loop exit
PB: predicated region body
PF: predicated region fallthrough
CT: control target
= control target key end

     0   :  { %vm116_vm0 = vcmask 1043456   ;;  %vm67_vm1 = vcmask 31744   ;;  %vm315_vm3 = vcmask 64512   ;;  %s1600_s1 = inlined_call_operand.vmem [shape: f32[4,8], index: 1, kind: input, shape index: {}]   ;;  %s1601_s0 = inlined_call_operand.vmem [shape: f32[128,4], index: 0, kind: input, shape index: {}]   ;;  %s1602_s5 = inlined_call_operand.vmem [shape: f32[32,16], index: 5, kind: input, shape index: {}]   ;;  %s1603_s2 = inlined_call_operand.vmem [shape: f32[1,8], index: 2, kind: input, shape index: {}]   ;;  %s1604_s3 = inlined_call_operand.vmem [shape: f32[1,8], index: 3, kind: input, shape index: {}]   ;;  %s1605_s4 = inlined_call_operand.vmem [shape: f32[1,8], index: 4, kind: input, shape index: {}]   ;;  %s1606_s6 = inlined_call_operand.vmem [shape: f32[1,16], index: 6, kind: input, shape index: {}]   ;;  %s1607_s7 = inlined_call_operand.vmem [shape: f32[1,16], index: 7, kind: input, shape index: {}]   ;;  %s1608_s8 = inlined_call_operand.vmem [shape: f32[1,16], index: 8, kind: input, shape index: {}]   ;;  %s1609_s9 = inlined_call_operand.vmem [shape: f32[32,16], index: 9, kind: input, shape index: {}]   ;;  %s1610_s10 = inlined_call_operand.vmem [shape: f32[2,32], index: 10, kind: input, shape index: {}]   ;;  %s1611_s11 = inlined_call_operand.<no memory space> [shape: f32[1,1], index: 11, kind: input, shape index: {}]   ;;  %s1612_s12 = inlined_call_operand.vmem [shape: f32[2,1], index: 12, kind: output, shape index: {}]  }
   0x1   :  { %v59_v0 = vld [vmem:[%s1600_s1] sm:$0xf]  ;;  %v44_v2 = vld [vmem:[%s1601_s0 + $0x8] sm:$0xff]  ;;  %v45_v3 = vld [vmem:[%s1601_s0 + $0x10] sm:$0xff] }
   0x2   :  { %v43_v1 = vld [vmem:[%s1601_s0] sm:$0xff]  ;;  %1136 = vmatprep.subr.msk.mxu0 %vm116_vm0, %v59_v0  ;;  %v46_v4 = vld [vmem:[%s1601_s0 + $0x18] sm:$0xff]  ;;  %v48_v6 = vld [vmem:[%s1601_s0 + $0x28] sm:$0xff] }
   0x3   :  { %1138 = vmatprep.mubr.msk.f32.mxu0 %vm67_vm1, %v43_v1  ;;  %1137 = vmatpush3.msk.msra.mxu0 %vm116_vm0, %v59_v0  ;;  %v47_v5 = vld [vmem:[%s1601_s0 + $0x20] sm:$0xff]  ;;  %v49_v7 = vld [vmem:[%s1601_s0 + $0x30] sm:$0xff]  ;;  %v50_v8 = vld [vmem:[%s1601_s0 + $0x38] sm:$0xff] }
   0x4   :  { %1139 = vmatmul.mubr.msk.f32.vlgmr.msra.gmra.mrb[0].mxu0 %vm67_vm1, %v44_v2  ;;  %v51_v9 = vld [vmem:[%s1601_s0 + $0x40] sm:$0xff]  ;;  %v52_v10 = vld [vmem:[%s1601_s0 + $0x48] sm:$0xff]  ;;  %v53_v11 = vld [vmem:[%s1601_s0 + $0x50] sm:$0xff] }
   0x5   :  { %1141 = vmatprep.mubr.msk.f32.mxu0 %vm67_vm1, %v45_v3  ;;  %v54_v12 = vld [vmem:[%s1601_s0 + $0x58] sm:$0xff]  ;;  %v55_v13 = vld [vmem:[%s1601_s0 + $0x60] sm:$0xff]  ;;  %v56_v14 = vld [vmem:[%s1601_s0 + $0x68] sm:$0xff] }
   0x6   :  { %v57_v15 = vld [vmem:[%s1601_s0 + $0x70] sm:$0xff]  ;;  %v58_v16 = vld [vmem:[%s1601_s0 + $0x78] sm:$0xff]  ;;  %v460_v17 = vld [vmem:[%s1602_s5] sm:$0xff] }
   0x7   :  { %1162 = vmatprep.subr.mxu1 %v460_v17  ;;  %v1379_v18 = vld [vmem:[%s1602_s5 + $0x8] sm:$0xff]  ;;  %v1385_v19 = vld [vmem:[%s1603_s2] ss:$0 sm:$0xff] }
   0x8   :  { %1142 = vmatmul.mubr.msk.f32.gmra.mrb[2].mxu0 %vm67_vm1, %v46_v4  ;;  %1163 = vmatpush3.msra.mxu1 %v460_v17 }
   0x9   :  { %1144 = vmatprep.mubr.msk.f32.mxu0 %vm67_vm1, %v47_v5  ;;  %1170 = vmatprep.subr.mxu1 %v1379_v18 }
   0xc   :  { %1145 = vmatmul.mubr.msk.f32.gmra.mrb[4].mxu0 %vm67_vm1, %v48_v6 }
   0xd   :  { %1147 = vmatprep.mubr.msk.f32.mxu0 %vm67_vm1, %v49_v7 }
  0x10   :  { %1148 = vmatmul.mubr.msk.f32.gmra.mrb[6].mxu0 %vm67_vm1, %v50_v8 }
  0x11   :  { %1150 = vmatprep.mubr.msk.f32.mxu0 %vm67_vm1, %v51_v9 }
  0x14   :  { %1151 = vmatmul.mubr.msk.f32.gmra.mrb[8].mxu0 %vm67_vm1, %v52_v10 }
  0x15   :  { %1153 = vmatprep.mubr.msk.f32.mxu0 %vm67_vm1, %v53_v11 }
  0x18   :  { %1154 = vmatmul.mubr.msk.f32.gmra.mrb[10].mxu0 %vm67_vm1, %v54_v12 }
  0x19   :  { %1156 = vmatprep.mubr.msk.f32.mxu0 %vm67_vm1, %v55_v13 }
  0x1c   :  { %1157 = vmatmul.mubr.msk.f32.gmra.mrb[12].mxu0 %vm67_vm1, %v56_v14 }
  0x1d   :  { %1159 = vmatprep.mubr.msk.f32.mxu0 %vm67_vm1, %v57_v15 }
  0x20   :  { %1160 = vmatmul.mubr.msk.f32.gmra.mrb[14].mxu0 %vm67_vm1, %v58_v16 }
  0xd7   :  { %v1140_v20 = vpop.f32.mrb[0].mxu0 }
  0xd8   :  { %v192_v21 = vadd.f32 %v1140_v20, %v1385_v19  ;;  %v186_v22 = vpop.f32.mrb[1].mxu0 }
  0xd9   :  { %v187_v23 = vadd.f32 %v1385_v19, %v186_v22 }
  0xda   :  { %vm266_vm2 = vcmp.gt.f32.partialorder %v192_v21, 0.0  ;;  %v282_v24 = vmul.f32 0.01, %v192_v21 }
  0xdb   :  { %vm265_vm4 = vcmp.gt.f32.partialorder %v187_v23, 0.0  ;;  %v281_v25 = vmul.f32 0.01, %v187_v23  ;;  %v1143_v26 = vpop.f32.mrb[2].mxu0 }
  0xdc   :  { %v1389_v27 = vsel %vm266_vm2, %v192_v21, %v282_v24  ;;  %v202_v28 = vadd.f32 %v1143_v26, %v1385_v19  ;;  %v196_v29 = vpop.f32.mrb[3].mxu0 }
  0xdd   :  { %v317_v30 = vsel %vm315_vm3, %v1389_v27, 0.0  ;;  %v356_v31 = vmul.f32 %v1389_v27, %v1389_v27  ;;  %v1396_v32 = vsel %vm265_vm4, %v187_v23, %v281_v25  ;;  %v197_v33 = vadd.f32 %v1385_v19, %v196_v29 }
  0xde   :  { %v316_v34 = vsel %vm315_vm3, %v1396_v32, 0.0  ;;  %v355_v35 = vmul.f32 %v1396_v32, %v1396_v32  ;;  %vm268_vm5 = vcmp.gt.f32.partialorder %v202_v28, 0.0  ;;  %v284_v36 = vmul.f32 0.01, %v202_v28 }
  0xdf   :  { %vm267_vm6 = vcmp.gt.f32.partialorder %v197_v33, 0.0  ;;  %v283_v37 = vmul.f32 0.01, %v197_v33  ;;  %v1146_v38 = vpop.f32.mrb[4].mxu0  ;;  %v372_v39 = vsel %vm315_vm3, %v356_v31, 0.0  ;;  %v318_v44 = vadd.f32 %v317_v30, %v316_v34 }
  0xe0   :  { %v371_v40 = vsel %vm315_vm3, %v355_v35, 0.0  ;;  %v1405_v41 = vsel %vm268_vm5, %v202_v28, %v284_v36  ;;  %v212_v42 = vadd.f32 %v1146_v38, %v1385_v19  ;;  %v206_v43 = vpop.f32.mrb[5].mxu0  ;;  %vm1239_vm4 = vmmov 0  }
  0xe1   :  { %v1408_v45 = vsel %vm267_vm6, %v197_v33, %v283_v37  ;;  %v373_v49 = vadd.f32 %v372_v39, %v371_v40  ;;  %v358_v50 = vmul.f32 %v1405_v41, %v1405_v41  ;;  %v207_v52 = vadd.f32 %v1385_v19, %v206_v43 }
  0xe2   :  { %v319_v46 = vsel %vm315_vm3, %v1408_v45, 0.0  ;;  %v357_v47 = vmul.f32 %v1408_v45, %v1408_v45  ;;  %vm270_vm7 = vcmp.gt.f32.partialorder %v212_v42, 0.0  ;;  %v286_v48 = vmul.f32 0.01, %v212_v42 }
  0xe3   :  { %v320_v51 = vadd.f32 %v319_v46, %v318_v44  ;;  %v1149_v53 = vpop.f32.mrb[6].mxu0  ;;  %v321_v58 = vsel %vm315_vm3, %v1405_v41, 0.0  ;;  %vm269_vm8 = vcmp.gt.f32.partialorder %v207_v52, 0.0  ;;  %v285_v61 = vmul.f32 0.01, %v207_v52 }
  0xe4   :  { %v374_v54 = vsel %vm315_vm3, %v357_v47, 0.0  ;;  %v1418_v55 = vsel %vm270_vm7, %v212_v42, %v286_v48  ;;  %v222_v56 = vadd.f32 %v1149_v53, %v1385_v19  ;;  %v216_v57 = vpop.f32.mrb[7].mxu0  ;;  %v376_v0 = vsel %vm315_vm3, %v358_v50, 0.0 }
  0xe5   :  { %v375_v59 = vadd.f32 %v374_v54, %v373_v49  ;;  %v360_v60 = vmul.f32 %v1418_v55, %v1418_v55  ;;  %v322_v62 = vadd.f32 %v321_v58, %v320_v51  ;;  %v217_v1 = vadd.f32 %v1385_v19, %v216_v57 }
  0xe6   :  { %v288_v63 = vmul.f32 0.01, %v222_v56  ;;  %vm272_vm9 = vcmp.gt.f32.partialorder %v222_v56, 0.0  ;;  %v1427_v3 = vsel %vm269_vm8, %v207_v52, %v285_v61  ;;  %v325_v7 = vsel %vm315_vm3, %v1418_v55, 0.0 }
  0xe7   :  { %v1152_v2 = vpop.f32.mrb[8].mxu0  ;;  %v377_v4 = vadd.f32 %v376_v0, %v375_v59  ;;  %v380_v8 = vsel %vm315_vm3, %v360_v60, 0.0  ;;  %v323_v9 = vsel %vm315_vm3, %v1427_v3, 0.0  ;;  %v359_v10 = vmul.f32 %v1427_v3, %v1427_v3 }
  0xe8   :  { %v232_v5 = vadd.f32 %v1152_v2, %v1385_v19  ;;  %v226_v6 = vpop.f32.mrb[9].mxu0  ;;  %v324_v11 = vadd.f32 %v323_v9, %v322_v62  ;;  %v1437_v12 = vsel %vm272_vm9, %v222_v56, %v288_v63  ;;  %vm271_vm10 = vcmp.gt.f32.partialorder %v217_v1, 0.0 }
  0xe9   :  { %v287_v13 = vmul.f32 0.01, %v217_v1  ;;  %v378_v14 = vsel %vm315_vm3, %v359_v10, 0.0  ;;  %v227_v16 = vadd.f32 %v1385_v19, %v226_v6  ;;  %v329_v25 = vsel %vm315_vm3, %v1437_v12, 0.0 }
  0xea   :  { %vm274_vm11 = vcmp.gt.f32.partialorder %v232_v5, 0.0  ;;  %v290_v15 = vmul.f32 0.01, %v232_v5  ;;  %v379_v20 = vadd.f32 %v378_v14, %v377_v4  ;;  %v326_v22 = vadd.f32 %v325_v7, %v324_v11 }
  0xeb   :  { %v1155_v17 = vpop.f32.mrb[10].mxu0  ;;  %v1441_v21 = vsel %vm271_vm10, %v217_v1, %v287_v13  ;;  %v362_v26 = vmul.f32 %v1437_v12, %v1437_v12  ;;  %vm273_vm12 = vcmp.gt.f32.partialorder %v227_v16, 0.0  ;;  %v289_v35 = vmul.f32 0.01, %v227_v16 }
  0xec   :  { %v242_v23 = vadd.f32 %v1155_v17, %v1385_v19  ;;  %v236_v24 = vpop.f32.mrb[11].mxu0  ;;  %v327_v28 = vsel %vm315_vm3, %v1441_v21, 0.0  ;;  %v361_v29 = vmul.f32 %v1441_v21, %v1441_v21  ;;  %v381_v31 = vadd.f32 %v380_v8, %v379_v20 }
  0xed   :  { %v328_v30 = vadd.f32 %v327_v28, %v326_v22  ;;  %v1452_v33 = vsel %vm274_vm11, %v232_v5, %v290_v15  ;;  %v237_v39 = vadd.f32 %v1385_v19, %v236_v24  ;;  %v384_v42 = vsel %vm315_vm3, %v362_v26, 0.0 }
  0xee   :  { %v382_v34 = vsel %vm315_vm3, %v361_v29, 0.0  ;;  %vm276_vm13 = vcmp.gt.f32.partialorder %v242_v23, 0.0  ;;  %v292_v36 = vmul.f32 0.01, %v242_v23  ;;  %v364_v43 = vmul.f32 %v1452_v33, %v1452_v33 }
  0xef   :  { %v383_v37 = vadd.f32 %v382_v34, %v381_v31  ;;  %v330_v38 = vadd.f32 %v329_v25, %v328_v30  ;;  %v1158_v40 = vpop.f32.mrb[12].mxu0  ;;  %v1459_v44 = vsel %vm273_vm12, %v227_v16, %v289_v35  ;;  %v333_v52 = vsel %vm315_vm3, %v1452_v33, 0.0 }
  0xf0   :  { %v252_v46 = vadd.f32 %v1158_v40, %v1385_v19  ;;  %v246_v47 = vpop.f32.mrb[13].mxu0  ;;  %v331_v48 = vsel %vm315_vm3, %v1459_v44, 0.0  ;;  %v363_v49 = vmul.f32 %v1459_v44, %v1459_v44  ;;  %v1466_v51 = vsel %vm276_vm13, %v242_v23, %v292_v36 }
  0xf1   :  { %v385_v50 = vadd.f32 %v384_v42, %v383_v37  ;;  %v332_v53 = vadd.f32 %v331_v48, %v330_v38  ;;  %vm275_vm14 = vcmp.gt.f32.partialorder %v237_v39, 0.0  ;;  %v291_v54 = vmul.f32 0.01, %v237_v39 }
  0xf2   :  { %v386_v57 = vsel %vm315_vm3, %v363_v49, 0.0  ;;  %vm278_vm15 = vcmp.gt.f32.partialorder %v252_v46, 0.0  ;;  %v294_v58 = vmul.f32 0.01, %v252_v46  ;;  %v247_v59 = vadd.f32 %v1385_v19, %v246_v47 }
  0xf3   :  { %v1161_v56 = vpop.f32.mrb[14].mxu0  ;;  %v387_v61 = vadd.f32 %v386_v57, %v385_v50  ;;  %v366_v62 = vmul.f32 %v1466_v51, %v1466_v51  ;;  %v1474_v63 = vsel %vm275_vm14, %v237_v39, %v291_v54  ;;  %v334_v0 = vadd.f32 %v333_v52, %v332_v53 }
  0xf4   :  { %v256_v60 = vpop.f32.mrb[15].mxu0  ;;  %v388_v1 = vsel %vm315_vm3, %v364_v43, 0.0  ;;  %v335_v2 = vsel %vm315_vm3, %v1474_v63, 0.0  ;;  %v365_v4 = vmul.f32 %v1474_v63, %v1474_v63  ;;  %v1481_v5 = vsel %vm278_vm15, %v252_v46, %v294_v58 }
  0xf5   :  { %v337_v6 = vsel %vm315_vm3, %v1466_v51, 0.0  ;;  %v336_v7 = vadd.f32 %v335_v2, %v334_v0  ;;  %v389_v8 = vadd.f32 %v388_v1, %v387_v61  ;;  %vm277_vm0 = vcmp.gt.f32.partialorder %v247_v59, 0.0 }
  0xf6   :  { %v390_v9 = vsel %vm315_vm3, %v365_v4, 0.0  ;;  %v293_v10 = vmul.f32 0.01, %v247_v59  ;;  %v262_v11 = vadd.f32 %v1161_v56, %v1385_v19  ;;  %v257_v13 = vadd.f32 %v1385_v19, %v256_v60 }
  0xf7   :  { %v392_v14 = vsel %vm315_vm3, %v366_v62, 0.0  ;;  %v391_v15 = vadd.f32 %v390_v9, %v389_v8  ;;  %v368_v16 = vmul.f32 %v1481_v5, %v1481_v5  ;;  %v338_v17 = vadd.f32 %v337_v6, %v336_v7 }
  0xf8   :  { %v1491_v20 = vsel %vm277_vm0, %v247_v59, %v293_v10  ;;  %vm280_vm1 = vcmp.gt.f32.partialorder %v262_v11, 0.0  ;;  %v296_v22 = vmul.f32 0.01, %v262_v11  ;;  %vm279_vm2 = vcmp.gt.f32.partialorder %v257_v13, 0.0 }
  0xf9   :  { %v339_v23 = vsel %vm315_vm3, %v1491_v20, 0.0  ;;  %v367_v24 = vmul.f32 %v1491_v20, %v1491_v20  ;;  %v393_v25 = vadd.f32 %v392_v14, %v391_v15  ;;  %v295_v19 = vmul.f32 0.01, %v257_v13 }
  0xfa   :  { %v340_v26 = vadd.f32 %v339_v23, %v338_v17  ;;  %v1497_v28 = vsel %vm280_vm1, %v262_v11, %v296_v22  ;;  %v341_v29 = vsel %vm315_vm3, %v1481_v5, 0.0  ;;  %v396_v38 = vsel %vm315_vm3, %v368_v16, 0.0  ;;  %v313_v11 = vld [vmem:[%s1604_s3] sm:$0x1] }
  0xfb   :  { %v394_v30 = vsel %vm315_vm3, %v367_v24, 0.0  ;;  %v311_v31 = vsel %vm279_vm2, %v257_v13, %v295_v19  ;;  %v370_v39 = vmul.f32 %v1497_v28, %v1497_v28  ;;  %v345_v46 = vsel %vm315_vm3, %v1497_v28, 0.0  ;;  %v314_v16 = vld [vmem:[%s1605_s4] sm:$0x1] }
  0xfc   :  { %v395_v34 = vadd.f32 %v394_v30, %v393_v25  ;;  %v342_v35 = vadd.f32 %v341_v29, %v340_v26  ;;  %v343_v36 = vsel %vm315_vm3, %v311_v31, 0.0  ;;  %v369_v37 = vmul.f32 %v311_v31, %v311_v31 }
  0xfd   :  { %v400_v49 = vsel %vm315_vm3, %v370_v39, 0.0  ;;  %v415_v9 = vlaneseq  ;;  %vm889_vm6 = vcmask 130048   ;;  %vm959_vm9 = vcmask 261120  }
  0xfe   :  { %v344_v40 = vadd.f32 %v343_v36, %v342_v35  ;;  %v397_v42 = vadd.f32 %v396_v38, %v395_v34  ;;  %v398_v43 = vsel %vm315_vm3, %v369_v37, 0.0  ;;  %vm1033_vm10 = vcmask 123904  }
  0xff   :  { %v416_v10 = vshrl.u32 %v415_v9, 7  ;;  %vm1051_vm11 = vcmask 1024  }
 0x100   :  { %v346_v47 = vadd.f32 %v345_v46, %v344_v40  ;;  %v399_v48 = vadd.f32 %v398_v43, %v397_v42 }
 0x101   :  { %v1513_v13 = vsub.s32 0, %v416_v10 }
 0x102   :  { %v347_v50 = vrot.slane %v346_v47, 4  ;;  %v401_v52 = vadd.f32 %v400_v49, %v399_v48 }
 0x104   :  { %v348_v53 = vadd.f32 %v347_v50, %v346_v47  ;;  %v402_v54 = vrot.slane %v401_v52, 4 }
 0x106   :  { %v349_v56 = vrot.slane %v348_v53, 2  ;;  %v403_v57 = vadd.f32 %v402_v54, %v401_v52  ;;  %v463_v52 = vld [vmem:[%s1602_s5 + $0x18] sm:$0xff] }
 0x108   :  { %v350_v58 = vadd.f32 %v349_v56, %v348_v53  ;;  %v404_v59 = vrot.slane %v403_v57, 2 }
 0x10a   :  { %v351_v60 = vrot.slane %v350_v58, 1  ;;  %v405_v61 = vadd.f32 %v404_v59, %v403_v57 }
 0x10c   :  { %v352_v62 = vadd.f32 %v351_v60, %v350_v58  ;;  %v406_v0 = vrot.slane %v405_v61, 1 }
 0x10e   :  { %v354_v1 = vmul.f32 0.0078125, %v352_v62  ;;  %v407_v2 = vadd.f32 %v406_v0, %v405_v61 }
 0x110   :  { %v408_v4 = vmul.f32 0.0078125, %v407_v2  ;;  %v409_v6 = vmul.f32 %v354_v1, %v354_v1 }
 0x112   :  { %v410_v7 = vsub.f32 %v408_v4, %v409_v6 }
 0x114   :  { %v411_v8 = vadd.f32 1e-05, %v410_v7 }
 0x116   :  { %1230 = vrsqrt.f32 %v411_v8 }
 0x120   :  { %v1231_v14 = vpop.eup %1230 }
 0x121   :  { %v413_v15 = vmul.f32 %v1231_v14, %v313_v11 }
 0x123   :  { %v418_v17 = vrot.slane %v413_v15, %v1513_v13  ;;  %v436_v22 = vmul.f32 %v413_v15, %v354_v1 }
 0x125   :  { %v434_v23 = vmul.f32 %v418_v17, %v311_v31  ;;  %v437_v24 = vsub.f32 %v314_v16, %v436_v22  ;;  %v420_v25 = vmul.f32 %v418_v17, %v1396_v32  ;;  %v421_v19 = vmul.f32 %v418_v17, %v1389_v27 }
 0x126   :  { %v422_v26 = vmul.f32 %v418_v17, %v1408_v45  ;;  %v423_v29 = vmul.f32 %v418_v17, %v1405_v41  ;;  %v424_v30 = vmul.f32 %v418_v17, %v1427_v3  ;;  %v425_v34 = vmul.f32 %v418_v17, %v1418_v55 }
 0x127   :  { %v442_v35 = vrot.slane %v437_v24, %v1513_v13  ;;  %v426_v36 = vmul.f32 %v418_v17, %v1441_v21  ;;  %v427_v37 = vmul.f32 %v418_v17, %v1437_v12  ;;  %v428_v31 = vmul.f32 %v418_v17, %v1459_v44 }
 0x128   :  { %v429_v32 = vmul.f32 %v418_v17, %v1452_v33  ;;  %v430_v27 = vmul.f32 %v418_v17, %v1474_v63  ;;  %v431_v45 = vmul.f32 %v418_v17, %v1466_v51  ;;  %v432_v41 = vmul.f32 %v418_v17, %v1491_v20  ;;  %v462_v33 = vld [vmem:[%s1602_s5 + $0x10] sm:$0xff] }
 0x129   :  { %v444_v38 = vadd.f32 %v442_v35, %v420_v25  ;;  %v445_v3 = vadd.f32 %v442_v35, %v421_v19  ;;  %v446_v39 = vadd.f32 %v442_v35, %v422_v26  ;;  %v447_v55 = vadd.f32 %v442_v35, %v423_v29 }
 0x12a   :  { %v448_v40 = vadd.f32 %v442_v35, %v424_v30  ;;  %v449_v42 = vadd.f32 %v442_v35, %v425_v34  ;;  %v450_v43 = vadd.f32 %v442_v35, %v426_v36  ;;  %v451_v21 = vadd.f32 %v442_v35, %v427_v37 }
 0x12b   :  { %1164 = vmatprep.mubr.msk.f32.mxu1 %vm315_vm3, %v444_v38  ;;  %v452_v12 = vadd.f32 %v442_v35, %v428_v31  ;;  %v453_v44 = vadd.f32 %v442_v35, %v429_v32  ;;  %v454_v63 = vadd.f32 %v442_v35, %v430_v27  ;;  %v455_v51 = vadd.f32 %v442_v35, %v431_v45 }
 0x12c   :  { %1165 = vmatmul.mubr.msk.f32.vlgmr.msra.gmra.mrb[0].mxu1 %vm315_vm3, %v445_v3  ;;  %v456_v20 = vadd.f32 %v442_v35, %v432_v41  ;;  %v433_v46 = vmul.f32 %v418_v17, %v1481_v5  ;;  %v458_v47 = vadd.f32 %v442_v35, %v434_v23  ;;  %v435_v48 = vmul.f32 %v418_v17, %v1497_v28  ;;  %v1079_v28 = vld [vmem:[%s1606_s6] ss:$0 sm:$0xff] }
 0x12d   :  { %1167 = vmatprep.mubr.msk.f32.mxu1 %vm315_vm3, %v446_v39  ;;  %1171 = vmatpush3.msra.mxu1 %v1379_v18  ;;  %v1238_v18 = vmov 0.0|0.0   ;;  %v1240_v5 = vmov 0.0  }
 0x12e   :  { %1178 = vmatprep.subr.mxu1 %v462_v33  ;;  %v457_v49 = vadd.f32 %v442_v35, %v433_v46  ;;  %v459_v50 = vadd.f32 %v442_v35, %v435_v48  ;;  %1205 = vmatprep.subr.bf16.mxu0 %v1238_v18  ;;  %v888_v46 = vld [vmem:[%s1608_s8] sm:$0x1] }
 0x12f   :  { %1202 = vmatprep.mubr.msk.f32.mxu0 %vm1239_vm4, %v1240_v5 }
 0x130   :  { %1168 = vmatmul.mubr.msk.f32.gmra.mrb[2].mxu1 %vm315_vm3, %v447_v55 }
 0x131   :  { %1172 = vmatprep.mubr.msk.f32.mxu1 %vm315_vm3, %v448_v40 }
 0x134   :  { %1173 = vmatmul.mubr.msk.f32.vlgmr.msra.gmra.mrb[0].mxu1 %vm315_vm3, %v449_v42 }
 0x135   :  { %1175 = vmatprep.mubr.msk.f32.mxu1 %vm315_vm3, %v450_v43  ;;  %1179 = vmatpush3.msra.mxu1 %v462_v33 }
 0x136   :  { %1186 = vmatprep.subr.mxu1 %v463_v52 }
 0x138   :  { %1176 = vmatmul.mubr.msk.f32.gmra.mrb[2].mxu1 %vm315_vm3, %v451_v21 }
 0x139   :  { %1180 = vmatprep.mubr.msk.f32.mxu1 %vm315_vm3, %v452_v12 }
 0x13c   :  { %1181 = vmatmul.mubr.msk.f32.vlgmr.msra.gmra.mrb[0].mxu1 %vm315_vm3, %v453_v44 }
 0x13d   :  { %1183 = vmatprep.mubr.msk.f32.mxu1 %vm315_vm3, %v454_v63  ;;  %1187 = vmatpush3.msra.mxu1 %v463_v52  ;;  %v887_v63 = vld [vmem:[%s1607_s7] sm:$0x1] }
 0x140   :  { %1184 = vmatmul.mubr.msk.f32.gmra.mrb[2].mxu1 %vm315_vm3, %v455_v51 }
 0x141   :  { %1188 = vmatprep.mubr.msk.f32.mxu1 %vm315_vm3, %v456_v20 }
 0x144   :  { %1189 = vmatmul.mubr.msk.f32.vlgmr.msra.gmra.mrb[0].mxu1 %vm315_vm3, %v457_v49 }
 0x145   :  { %1191 = vmatprep.mubr.msk.f32.mxu1 %vm315_vm3, %v458_v47 }
 0x148   :  { %1192 = vmatmul.mubr.msk.f32.gmra.mrb[2].mxu1 %vm315_vm3, %v459_v50 }
 0x217   :  { %v1190_v53 = vpop.f32.mrb[0].mxu1 }
 0x218   :  { %v1211_v54 = vadd.f32 %v1190_v53, %v1079_v28  ;;  %v852_v56 = vpop.f32.mrb[1].mxu1 }
 0x219   :  { %v1212_v57 = vadd.f32 %v1079_v28, %v852_v56  ;;  %v951_v56 = vld [vmem:[%s1609_s9 + $0x8] sm:$0xff] }
 0x21a   :  { %vm876_vm5 = vcmp.gt.f32.partialorder %v1211_v54, 0.0  ;;  %v880_v58 = vmul.f32 0.01, %v1211_v54 }
 0x21b   :  { %vm875_vm7 = vcmp.gt.f32.partialorder %v1212_v57, 0.0  ;;  %v879_v59 = vmul.f32 0.01, %v1212_v57  ;;  %v1193_v60 = vpop.f32.mrb[2].mxu1 }
 0x21c   :  { %v884_v61 = vsel %vm876_vm5, %v1211_v54, %v880_v58  ;;  %v1213_v62 = vadd.f32 %v1193_v60, %v1079_v28  ;;  %v862_v0 = vpop.f32.mrb[3].mxu1  ;;  %v950_v54 = vld [vmem:[%s1609_s9] sm:$0xff]  ;;  %v953_v58 = vld [vmem:[%s1609_s9 + $0x18] sm:$0xff] }
 0x21d   :  { %v891_v1 = vsel %vm889_vm6, %v884_v61, 0.0  ;;  %v906_v2 = vmul.f32 %v884_v61, %v884_v61  ;;  %v883_v4 = vsel %vm875_vm7, %v1212_v57, %v879_v59  ;;  %v1214_v6 = vadd.f32 %v1079_v28, %v862_v0  ;;  %v952_v57 = vld [vmem:[%s1609_s9 + $0x10] sm:$0xff] }
 0x21e   :  { %v890_v7 = vsel %vm889_vm6, %v883_v4, 0.0  ;;  %v905_v8 = vmul.f32 %v883_v4, %v883_v4  ;;  %vm878_vm3 = vcmp.gt.f32.partialorder %v1213_v62, 0.0  ;;  %v882_v9 = vmul.f32 0.01, %v1213_v62 }
 0x21f   :  { %v910_v10 = vsel %vm889_vm6, %v906_v2, 0.0  ;;  %v892_v11 = vadd.f32 %v891_v1, %v890_v7  ;;  %vm877_vm8 = vcmp.gt.f32.partialorder %v1214_v6, 0.0  ;;  %v881_v14 = vmul.f32 0.01, %v1214_v6  ;;  %v958_v7 = vld [vmem:[%s1610_s10] sm:$0x3] }
 0x220   :  { %v909_v15 = vsel %vm889_vm6, %v905_v8, 0.0  ;;  %v886_v16 = vsel %vm878_vm3, %v1213_v62, %v882_v9  ;;  %v17_v8 = vstv %s1611_s11 }
 0x221   :  { %v911_v17 = vadd.f32 %v910_v10, %v909_v15  ;;  %v885_v22 = vsel %vm877_vm8, %v1214_v6, %v881_v14  ;;  %v908_v23 = vmul.f32 %v886_v16, %v886_v16  ;;  %v895_v26 = vsel %vm889_vm6, %v886_v16, 0.0  ;;  %18 = vst [vmem:[#allocation2] sm:$0x1] %v17_v8 }
 0x222   :  { %v893_v24 = vsel %vm889_vm6, %v885_v22, 0.0  ;;  %v907_v25 = vmul.f32 %v885_v22, %v885_v22 }
 0x223   :  { %v894_v19 = vadd.f32 %v893_v24, %v892_v11  ;;  %v914_v35 = vsel %vm889_vm6, %v908_v23, 0.0 }
 0x224   :  { %v912_v29 = vsel %vm889_vm6, %v907_v25, 0.0 }
 0x225   :  { %v896_v30 = vadd.f32 %v895_v26, %v894_v19  ;;  %v913_v34 = vadd.f32 %v912_v29, %v911_v17 }
 0x227   :  { %v897_v36 = vrot.slane %v896_v30, 4  ;;  %v915_v37 = vadd.f32 %v914_v35, %v913_v34 }
 0x228   :  { %v1093_v14 = vld [vmem:[#allocation2] ss:$0 sm:$0xff] }
 0x229   :  { %v898_v31 = vadd.f32 %v897_v36, %v896_v30  ;;  %v916_v32 = vrot.slane %v915_v37, 4 }
 0x22b   :  { %v899_v27 = vrot.slane %v898_v31, 2  ;;  %v917_v45 = vadd.f32 %v916_v32, %v915_v37 }
 0x22d   :  { %v900_v41 = vadd.f32 %v899_v27, %v898_v31  ;;  %v918_v38 = vrot.slane %v917_v45, 2 }
 0x22f   :  { %v901_v3 = vrot.slane %v900_v41, 1  ;;  %v919_v39 = vadd.f32 %v918_v38, %v917_v45 }
 0x231   :  { %v902_v55 = vadd.f32 %v901_v3, %v900_v41  ;;  %v920_v40 = vrot.slane %v919_v39, 1 }
 0x233   :  { %v904_v42 = vmul.f32 0.03125, %v902_v55  ;;  %v921_v43 = vadd.f32 %v920_v40, %v919_v39 }
 0x235   :  { %v922_v21 = vmul.f32 0.03125, %v921_v43  ;;  %v923_v12 = vmul.f32 %v904_v42, %v904_v42 }
 0x237   :  { %v924_v33 = vsub.f32 %v922_v21, %v923_v12 }
 0x239   :  { %v925_v44 = vadd.f32 1e-05, %v924_v33 }
 0x23b   :  { %1232 = vrsqrt.f32 %v925_v44 }
 0x245   :  { %v1233_v51 = vpop.eup %1232 }
 0x246   :  { %v927_v20 = vmul.f32 %v1233_v51, %v887_v63 }
 0x248   :  { %v932_v47 = vrot.slane %v927_v20, %v1513_v13  ;;  %v938_v48 = vmul.f32 %v927_v20, %v904_v42 }
 0x24a   :  { %v936_v49 = vmul.f32 %v932_v47, %v885_v22  ;;  %v939_v50 = vsub.f32 %v888_v46, %v938_v48  ;;  %v934_v52 = vmul.f32 %v932_v47, %v883_v4  ;;  %v935_v5 = vmul.f32 %v932_v47, %v884_v61 }
 0x24b   :  { %v937_v28 = vmul.f32 %v932_v47, %v886_v16 }
 0x24c   :  { %v944_v53 = vrot.slane %v939_v50, %v1513_v13 }
 0x24e   :  { %v948_v59 = vadd.f32 %v944_v53, %v936_v49  ;;  %v946_v60 = vadd.f32 %v944_v53, %v934_v52  ;;  %v947_v61 = vadd.f32 %v944_v53, %v935_v5  ;;  %v949_v13 = vadd.f32 %v944_v53, %v937_v28 }
 0x250   :  { %v954_v62 = vmul.f32 %v950_v54, %v946_v60  ;;  %v955_v0 = vmul.f32 %v951_v56, %v947_v61  ;;  %v956_v1 = vmul.f32 %v952_v57, %v948_v59  ;;  %v957_v2 = vmul.f32 %v953_v58, %v949_v13 }
 0x252   :  { %v1206_v4 = vpack.c.bf16 %v955_v0, %v954_v62  ;;  %v1209_v6 = vpack.c.bf16 %v957_v2, %v956_v1 }
 0x254   :  { %1207 = vmatpush3.bf16.msra.mxu0 %v1206_v4 }
 0x255   :  { %1208 = vmatprep.subr.bf16.mxu0 %v1238_v18 }
 0x258   :  { %1210 = vmatpush3.bf16.msra.mxu0 %v1209_v6 }
 0x25b   :  { %1203 = vmatmul.mubr.msk.f32.vlgmr.msra.gmra.mrb[16].mxu0 %vm959_vm9, %v958_v7 }
 0x32e   :  { %v1029_v9 = vpop.f32.mrb[16].mxu0 }
 0x32f   :  { %v1204_v10 = vpop.f32.mrb[17].mxu0  ;;  %v1034_v11 = vsel %vm1033_vm10, %v1029_v9, 0.0 }
 0x330   :  { %1035 = vadd.xlane.f32.xlu0 %v1034_v11 }
 0x3bd   :  { %v1036_v15 = vpop.xlane.xlu0 %1035 }
 0x3be   :  { %v1044_v18 = vadd.f32 %v1093_v14, %v1036_v15 }
 0x3c0   :  { %v1045_v16 = vsub.f32 0.0, %v1044_v18 }
 0x3c2   :  { %v1046_v17 = vmul.f32 1.442695, %v1045_v16 }
 0x3c4   :  { %1234 = vpow2.f32 %v1046_v17 }
 0x3ce   :  { %v1235_v22 = vpop.eup %1234 }
 0x3cf   :  { %v1048_v23 = vadd.f32 1.0, %v1235_v22 }
 0x3d1   :  { %1236 = vrcp.f32 %v1048_v23 }
 0x3db   :  { %v1237_v24 = vpop.eup %1236 }
 0x3dc   :  { %1052 = vst.msk [vmem:[%s1612_s12] sm:$0x3] %vm1051_vm11, %v1237_v24 }

</bundles_post_ra>
